<compile_context>
chip_gen: v6e
topology: v6e:2x2x1
jax: 0.10.0
libtpu: 0.0.40
codegen_flags: <defaults>
</compile_context>

<pallas_src>
import functools

import numpy as np
import jax
import jax.numpy as jnp
from jax.experimental import pallas as pl
from jax.experimental.pallas import tpu as pltpu

# ---------------- problem configuration ----------------
NUM_RAW = 2
NUM_ANGLE = 2
D_IN = 2 * NUM_RAW + 3 * NUM_ANGLE        # 10
HIDDEN = 32
BATCH = 16
OUT_PAD = 128                             # lane-dense padded output width
MAX_TILE_B = 256                          # fill MXU M-dim when batch scales


# ---------------- recombination constants ----------------
def _recomb_matrices(num_raw, num_angle, out_pad):
    """Constant (D, out_pad) matrices so that the symplectic recombination is
       out = (gradH @ G1) * (x @ X1 + C1) + (gradH @ G2) * (x @ X2),
    with output columns D..out_pad-1 identically zero (lane padding)."""
    nr, na = num_raw, num_angle
    D = 2 * nr + 3 * na
    i_r, i_x1, i_x2 = 0, nr, nr + na
    i_pr, i_pth = nr + 2 * na, 2 * nr + 2 * na
    G1 = np.zeros((D, out_pad), np.float32)
    G2 = np.zeros((D, out_pad), np.float32)
    X1 = np.zeros((D, out_pad), np.float32)
    X2 = np.zeros((D, out_pad), np.float32)
    C1 = np.zeros((1, out_pad), np.float32)
    for j in range(nr):                       # dr = dHdpr
        G1[i_pr + j, j] = 1.0
        C1[0, j] = 1.0
    for j in range(na):                       # dx1 = -x2 * dHdpth
        G1[i_pth + j, nr + j] = 1.0
        X1[i_x2 + j, nr + j] = -1.0
    for j in range(na):                       # dx2 = x1 * dHdpth
        G1[i_pth + j, nr + na + j] = 1.0
        X1[i_x1 + j, nr + na + j] = 1.0
    for j in range(nr):                       # dpr = -dHdr
        G1[i_r + j, nr + 2 * na + j] = 1.0
        C1[0, nr + 2 * na + j] = -1.0
    for j in range(na):                       # dpth = x2*dHdx1 - x1*dHdx2
        G1[i_x1 + j, 2 * nr + 2 * na + j] = 1.0
        X1[i_x2 + j, 2 * nr + 2 * na + j] = 1.0
        G2[i_x2 + j, 2 * nr + 2 * na + j] = 1.0
        X2[i_x1 + j, 2 * nr + 2 * na + j] = -1.0
    return G1, G2, X1, X2, C1


# ---------------- Pallas kernel ----------------
def hnn_kernel(x_ref, w0_ref, b0_ref, w1_ref, b1_ref, w2r_ref, w1t_ref,
               a12_ref, x12_ref, c12_ref, o_ref, *, out_pad):
    x = x_ref[...]                                                    # (TB, D)

    # ---- Hamiltonian MLP forward (we only need activations for the backprop)
    h1 = jnp.tanh(jnp.dot(x, w0_ref[...],
                          preferred_element_type=jnp.float32) + b0_ref[...])
    h2 = jnp.tanh(jnp.dot(h1, w1_ref[...],
                          preferred_element_type=jnp.float32) + b1_ref[...])

    # ---- analytic gradient of sum(H) w.r.t. x, backprop through the tanh MLP.
    # d(sum H)/dh2 = w2^T  (pre-transposed to a (1, H) row in the wrapper).
    g2 = w2r_ref[...] * (1.0 - h2 * h2)                               # (TB, H)
    g1 = jnp.dot(g2, w1t_ref[...],
                 preferred_element_type=jnp.float32) * (1.0 - h1 * h1)  # (TB, H)

    # ---- symplectic recombination on whole vregs (no lane slicing / concat):
    # gradH @ [G1 | G2] was folded into w0^T in the wrapper => g1 @ A12.
    gm = jnp.dot(g1, a12_ref[...], preferred_element_type=jnp.float32)   # (TB, 2*out_pad)
    xm = jnp.dot(x, x12_ref[...],
                 preferred_element_type=jnp.float32) + c12_ref[...]      # (TB, 2*out_pad)
    prod = gm * xm
    # 128-lane-aligned halves -> free slices; single lane-dense store.
    o_ref[...] = (prod[:, :out_pad] + prod[:, out_pad:]).astype(o_ref.dtype)


# ---------------- wrapper ----------------
def hnn_forward(x, w0, b0, w1, b1, w2, b2, *, tile_b=None):
    # b2 does not affect dH/dx and is intentionally unused.
    B, D = x.shape
    assert D == D_IN
    H = w0.shape[1]

    if tile_b is None:
        # Single grid step for small batches (removes per-step pipeline
        # overhead); cap at MAX_TILE_B to fill the MXU M-dim for large batches
        # and keep a "parallel" axis for v7x's two TensorCores.
        tile_b = B if B <= MAX_TILE_B else MAX_TILE_B
    assert B % tile_b == 0
    grid = (B // tile_b,)

    # ---- one-time wrapper-side pre-processing (no in-kernel transposes)
    G1, G2, X1, X2, C1 = _recomb_matrices(NUM_RAW, NUM_ANGLE, OUT_PAD)
    a12 = jnp.concatenate([w0.T @ jnp.asarray(G1), w0.T @ jnp.asarray(G2)], axis=1)  # (H, 2*OUT_PAD)
    x12 = jnp.asarray(np.concatenate([X1, X2], axis=1))                              # (D, 2*OUT_PAD)
    c12 = jnp.asarray(np.concatenate([C1, np.zeros_like(C1)], axis=1))               # (1, 2*OUT_PAD)
    w1t = w1.T                                                                        # (H, H)
    w2r = w2.T                                                                        # (1, H)

    full = lambda i: (0, 0)
    kernel = functools.partial(hnn_kernel, out_pad=OUT_PAD)

    out_padded = pl.pallas_call(
        kernel,
        out_shape=jax.ShapeDtypeStruct((B, OUT_PAD), x.dtype),
        grid=grid,
        in_specs=[
            pl.BlockSpec((tile_b, D), lambda i: (i, 0)),   # x tile
            pl.BlockSpec(w0.shape, full),                  # W0  (D, H)
            pl.BlockSpec(b0.shape, full),                  # b0  (1, H)
            pl.BlockSpec(w1.shape, full),                  # W1  (H, H)
            pl.BlockSpec(b1.shape, full),                  # b1  (1, H)
            pl.BlockSpec(w2r.shape, full),                 # W2^T row (1, H)
            pl.BlockSpec(w1t.shape, full),                 # W1^T (H, H)
            pl.BlockSpec(a12.shape, full),                 # w0^T@[G1|G2] (H, 256)
            pl.BlockSpec(x12.shape, full),                 # [X1|X2]      (D, 256)
            pl.BlockSpec(c12.shape, full),                 # [C1|0]       (1, 256)
        ],
        out_specs=pl.BlockSpec((tile_b, OUT_PAD), lambda i: (i, 0)),
        compiler_params=pltpu.CompilerParams(
            dimension_semantics=("parallel",)),
    )(x, w0, b0, w1, b1, w2r, w1t, a12, x12, c12)

    return out_padded[:, :D]


# ---------------- pure-JAX reference (for verification) ----------------
def _mlp_H(x, w0, b0, w1, b1, w2, b2):
    h1 = jnp.tanh(x @ w0 + b0)
    h2 = jnp.tanh(h1 @ w1 + b1)
    return jnp.sum(h2 @ w2 + b2)


def hnn_ref(x, w0, b0, w1, b1, w2, b2):
    gradH = jax.grad(_mlp_H)(x, w0, b0, w1, b1, w2, b2)
    nr, na = NUM_RAW, NUM_ANGLE
    dHdr, dHdx1, dHdx2, dHdpr, dHdpth = (
        gradH[:, 0:nr], gradH[:, nr:nr + na], gradH[:, nr + na:nr + 2 * na],
        gradH[:, nr + 2 * na:2 * nr + 2 * na], gradH[:, 2 * nr + 2 * na:])
    x1 = x[:, nr:nr + na]
    x2 = x[:, nr + na:nr + 2 * na]
    return jnp.concatenate(
        [dHdpr, -x2 * dHdpth, x1 * dHdpth, -dHdr, x2 * dHdx1 - x1 * dHdx2], axis=1)


# ---------------- main ----------------
if __name__ == "__main__":
    key = jax.random.PRNGKey(0)
    kx, k0, k1, k2 = jax.random.split(key, 4)

    x = jax.random.normal(kx, (BATCH, D_IN), dtype=jnp.float32)

    # deterministic "hamiltonianNet" parameters (tanh MLP: D_IN -> 32 -> 32 -> 1)
    w0 = 0.2 * jax.random.normal(k0, (D_IN, HIDDEN), dtype=jnp.float32)
    b0 = jnp.zeros((1, HIDDEN), dtype=jnp.float32)
    w1 = 0.2 * jax.random.normal(k1, (HIDDEN, HIDDEN), dtype=jnp.float32)
    b1 = jnp.zeros((1, HIDDEN), dtype=jnp.float32)
    w2 = 0.2 * jax.random.normal(k2, (HIDDEN, 1), dtype=jnp.float32)
    b2 = jnp.zeros((1, 1), dtype=jnp.float32)

    out = hnn_forward(x, w0, b0, w1, b1, w2, b2)
    out = jax.block_until_ready(out)

    ref = hnn_ref(x, w0, b0, w1, b1, w2, b2)
    assert out.shape == (BATCH, D_IN)
    assert jnp.allclose(out, ref, atol=1e-5, rtol=1e-5), "mismatch vs JAX reference"

    # TODO(synk): structured (PSD mass-matrix) and control-net branches of HNN are
    # config-dependent extra MLPs; only the default non-structured, no-control path
    # is implemented here.
    print("KERNEL_OK")
</pallas_src>

<mosaic_0001>
module attributes {stable_mosaic.version = 11 : i64} {
  func.func @hnn_kernel(%arg0: i32, %arg1: memref<16x10xf32, #tpu.memory_space<vmem>>, %arg2: memref<10x32xf32, #tpu.memory_space<vmem>>, %arg3: memref<1x32xf32, #tpu.memory_space<vmem>>, %arg4: memref<32x32xf32, #tpu.memory_space<vmem>>, %arg5: memref<1x32xf32, #tpu.memory_space<vmem>>, %arg6: memref<1x32xf32, #tpu.memory_space<vmem>>, %arg7: memref<32x32xf32, #tpu.memory_space<vmem>>, %arg8: memref<32x256xf32, #tpu.memory_space<vmem>>, %arg9: memref<10x256xf32, #tpu.memory_space<vmem>>, %arg10: memref<1x256xf32, #tpu.memory_space<vmem>>, %arg11: memref<16x128xf32, #tpu.memory_space<vmem>>) attributes {dimension_semantics = [#tpu.dimension_semantics<parallel>], iteration_bounds = array<i64: 1>, scalar_prefetch = 0 : i64, scratch_operands = 0 : i64, tpu.core_type = #tpu.core_type<tc>, window_params = [{transform_indices = @transform_0, window_bounds = array<i64: 16, 10>}, {pipeline_mode = #tpu.pipeline_mode<synchronous>, transform_indices = @transform_1, window_bounds = array<i64: 10, 32>}, {pipeline_mode = #tpu.pipeline_mode<synchronous>, transform_indices = @transform_2, window_bounds = array<i64: 1, 32>}, {pipeline_mode = #tpu.pipeline_mode<synchronous>, transform_indices = @transform_3, window_bounds = array<i64: 32, 32>}, {pipeline_mode = #tpu.pipeline_mode<synchronous>, transform_indices = @transform_4, window_bounds = array<i64: 1, 32>}, {pipeline_mode = #tpu.pipeline_mode<synchronous>, transform_indices = @transform_5, window_bounds = array<i64: 1, 32>}, {pipeline_mode = #tpu.pipeline_mode<synchronous>, transform_indices = @transform_6, window_bounds = array<i64: 32, 32>}, {pipeline_mode = #tpu.pipeline_mode<synchronous>, transform_indices = @transform_7, window_bounds = array<i64: 32, 256>}, {pipeline_mode = #tpu.pipeline_mode<synchronous>, transform_indices = @transform_8, window_bounds = array<i64: 10, 256>}, {pipeline_mode = #tpu.pipeline_mode<synchronous>, transform_indices = @transform_9, window_bounds = array<i64: 1, 256>}, {transform_indices = @transform_10, window_bounds = array<i64: 16, 128>}]} {
    %c0 = arith.constant 0 : index
    %c0_0 = arith.constant 0 : index
    %0 = vector.load %arg1[%c0, %c0_0] : memref<16x10xf32, #tpu.memory_space<vmem>>, vector<16x10xf32>
    %c0_1 = arith.constant 0 : index
    %c0_2 = arith.constant 0 : index
    %1 = vector.load %arg2[%c0_1, %c0_2] : memref<10x32xf32, #tpu.memory_space<vmem>>, vector<10x32xf32>
    %cst = arith.constant dense<0.000000e+00> : vector<16x32xf32>
    %2 = tpu.matmul %0, %1, %cst {dimension_numbers = #tpu.dot_dimension_numbers<[1], [0], [0], [1], [0, 0, 1, 1], [], []>} : vector<16x10xf32>, vector<10x32xf32>, vector<16x32xf32> -> vector<16x32xf32>
    %c0_3 = arith.constant 0 : index
    %c0_4 = arith.constant 0 : index
    %3 = vector.load %arg3[%c0_3, %c0_4] : memref<1x32xf32, #tpu.memory_space<vmem>>, vector<1x32xf32>
    %4 = vector.broadcast %3 : vector<1x32xf32> to vector<16x32xf32>
    %5 = arith.addf %2, %4 : vector<16x32xf32>
    %6 = math.tanh %5 : vector<16x32xf32>
    %c0_5 = arith.constant 0 : index
    %c0_6 = arith.constant 0 : index
    %7 = vector.load %arg4[%c0_5, %c0_6] : memref<32x32xf32, #tpu.memory_space<vmem>>, vector<32x32xf32>
    %cst_7 = arith.constant dense<0.000000e+00> : vector<16x32xf32>
    %8 = tpu.matmul %6, %7, %cst_7 {dimension_numbers = #tpu.dot_dimension_numbers<[1], [0], [0], [1], [0, 0, 1, 1], [], []>} : vector<16x32xf32>, vector<32x32xf32>, vector<16x32xf32> -> vector<16x32xf32>
    %c0_8 = arith.constant 0 : index
    %c0_9 = arith.constant 0 : index
    %9 = vector.load %arg5[%c0_8, %c0_9] : memref<1x32xf32, #tpu.memory_space<vmem>>, vector<1x32xf32>
    %10 = vector.broadcast %9 : vector<1x32xf32> to vector<16x32xf32>
    %11 = arith.addf %8, %10 : vector<16x32xf32>
    %12 = math.tanh %11 : vector<16x32xf32>
    %c0_10 = arith.constant 0 : index
    %c0_11 = arith.constant 0 : index
    %13 = vector.load %arg6[%c0_10, %c0_11] : memref<1x32xf32, #tpu.memory_space<vmem>>, vector<1x32xf32>
    %14 = arith.mulf %12, %12 : vector<16x32xf32>
    %cst_12 = arith.constant 1.000000e+00 : f32
    %15 = vector.broadcast %cst_12 : f32 to vector<16x32xf32>
    %16 = arith.subf %15, %14 : vector<16x32xf32>
    %17 = vector.broadcast %13 : vector<1x32xf32> to vector<16x32xf32>
    %18 = arith.mulf %17, %16 : vector<16x32xf32>
    %c0_13 = arith.constant 0 : index
    %c0_14 = arith.constant 0 : index
    %19 = vector.load %arg7[%c0_13, %c0_14] : memref<32x32xf32, #tpu.memory_space<vmem>>, vector<32x32xf32>
    %cst_15 = arith.constant dense<0.000000e+00> : vector<16x32xf32>
    %20 = tpu.matmul %18, %19, %cst_15 {dimension_numbers = #tpu.dot_dimension_numbers<[1], [0], [0], [1], [0, 0, 1, 1], [], []>} : vector<16x32xf32>, vector<32x32xf32>, vector<16x32xf32> -> vector<16x32xf32>
    %21 = arith.mulf %6, %6 : vector<16x32xf32>
    %cst_16 = arith.constant 1.000000e+00 : f32
    %22 = vector.broadcast %cst_16 : f32 to vector<16x32xf32>
    %23 = arith.subf %22, %21 : vector<16x32xf32>
    %24 = arith.mulf %20, %23 : vector<16x32xf32>
    %c0_17 = arith.constant 0 : index
    %c0_18 = arith.constant 0 : index
    %25 = vector.load %arg8[%c0_17, %c0_18] : memref<32x256xf32, #tpu.memory_space<vmem>>, vector<32x256xf32>
    %cst_19 = arith.constant dense<0.000000e+00> : vector<16x256xf32>
    %26 = tpu.matmul %24, %25, %cst_19 {dimension_numbers = #tpu.dot_dimension_numbers<[1], [0], [0], [1], [0, 0, 1, 1], [], []>} : vector<16x32xf32>, vector<32x256xf32>, vector<16x256xf32> -> vector<16x256xf32>
    %c0_20 = arith.constant 0 : index
    %c0_21 = arith.constant 0 : index
    %27 = vector.load %arg9[%c0_20, %c0_21] : memref<10x256xf32, #tpu.memory_space<vmem>>, vector<10x256xf32>
    %cst_22 = arith.constant dense<0.000000e+00> : vector<16x256xf32>
    %28 = tpu.matmul %0, %27, %cst_22 {dimension_numbers = #tpu.dot_dimension_numbers<[1], [0], [0], [1], [0, 0, 1, 1], [], []>} : vector<16x10xf32>, vector<10x256xf32>, vector<16x256xf32> -> vector<16x256xf32>
    %c0_23 = arith.constant 0 : index
    %c0_24 = arith.constant 0 : index
    %29 = vector.load %arg10[%c0_23, %c0_24] : memref<1x256xf32, #tpu.memory_space<vmem>>, vector<1x256xf32>
    %30 = vector.broadcast %29 : vector<1x256xf32> to vector<16x256xf32>
    %31 = arith.addf %28, %30 : vector<16x256xf32>
    %32 = arith.mulf %26, %31 : vector<16x256xf32>
    %33 = vector.extract_strided_slice %32 {offsets = [0, 0], sizes = [16, 128], strides = [1, 1]} : vector<16x256xf32> to vector<16x128xf32>
    %34 = vector.extract_strided_slice %32 {offsets = [0, 128], sizes = [16, 128], strides = [1, 1]} : vector<16x256xf32> to vector<16x128xf32>
    %35 = arith.addf %33, %34 : vector<16x128xf32>
    %c0_25 = arith.constant 0 : index
    %c0_26 = arith.constant 0 : index
    %36 = vector.load %arg11[%c0_25, %c0_26] : memref<16x128xf32, #tpu.memory_space<vmem>>, vector<16x128xf32>
    tpu.vector_store %arg11[%c0_25, %c0_26], %35 {strides = array<i32>} : memref<16x128xf32, #tpu.memory_space<vmem>>, vector<16x128xf32>,
    return
  }
  func.func @transform_0(%arg0: i32) -> (i32, i32) {
    %c0_i32 = arith.constant 0 : i32
    %c0_i32_0 = arith.constant 0 : i32
    return %arg0, %c0_i32 : i32, i32
  }
  func.func @transform_1(%arg0: i32) -> (i32, i32) {
    %c0_i32 = arith.constant 0 : i32
    %c0_i32_0 = arith.constant 0 : i32
    %c0_i32_1 = arith.constant 0 : i32
    return %c0_i32, %c0_i32_0 : i32, i32
  }
  func.func @transform_2(%arg0: i32) -> (i32, i32) {
    %c0_i32 = arith.constant 0 : i32
    %c0_i32_0 = arith.constant 0 : i32
    %c0_i32_1 = arith.constant 0 : i32
    return %c0_i32, %c0_i32_0 : i32, i32
  }
  func.func @transform_3(%arg0: i32) -> (i32, i32) {
    %c0_i32 = arith.constant 0 : i32
    %c0_i32_0 = arith.constant 0 : i32
    %c0_i32_1 = arith.constant 0 : i32
    return %c0_i32, %c0_i32_0 : i32, i32
  }
  func.func @transform_4(%arg0: i32) -> (i32, i32) {
    %c0_i32 = arith.constant 0 : i32
    %c0_i32_0 = arith.constant 0 : i32
    %c0_i32_1 = arith.constant 0 : i32
    return %c0_i32, %c0_i32_0 : i32, i32
  }
  func.func @transform_5(%arg0: i32) -> (i32, i32) {
    %c0_i32 = arith.constant 0 : i32
    %c0_i32_0 = arith.constant 0 : i32
    %c0_i32_1 = arith.constant 0 : i32
    return %c0_i32, %c0_i32_0 : i32, i32
  }
  func.func @transform_6(%arg0: i32) -> (i32, i32) {
    %c0_i32 = arith.constant 0 : i32
    %c0_i32_0 = arith.constant 0 : i32
    %c0_i32_1 = arith.constant 0 : i32
    return %c0_i32, %c0_i32_0 : i32, i32
  }
  func.func @transform_7(%arg0: i32) -> (i32, i32) {
    %c0_i32 = arith.constant 0 : i32
    %c0_i32_0 = arith.constant 0 : i32
    %c0_i32_1 = arith.constant 0 : i32
    return %c0_i32, %c0_i32_0 : i32, i32
  }
  func.func @transform_8(%arg0: i32) -> (i32, i32) {
    %c0_i32 = arith.constant 0 : i32
    %c0_i32_0 = arith.constant 0 : i32
    %c0_i32_1 = arith.constant 0 : i32
    return %c0_i32, %c0_i32_0 : i32, i32
  }
  func.func @transform_9(%arg0: i32) -> (i32, i32) {
    %c0_i32 = arith.constant 0 : i32
    %c0_i32_0 = arith.constant 0 : i32
    %c0_i32_1 = arith.constant 0 : i32
    return %c0_i32, %c0_i32_0 : i32, i32
  }
  func.func @transform_10(%arg0: i32) -> (i32, i32) {
    %c0_i32 = arith.constant 0 : i32
    %c0_i32_0 = arith.constant 0 : i32
    return %arg0, %c0_i32 : i32, i32
  }
}

</mosaic_0001>

<bundles_post_ra>
// kernel: tpu_custom_call.1
= control target key start
LH: loop header
LB: loop body
LE: loop exit
PB: predicated region body
PF: predicated region fallthrough
CT: control target
= control target key end

     0   :  { %15 = vsyncpa [#allocation3], 0  ;;  %s1012_s0 = inlined_call_operand.hbm [shape: f32[16,10], index: 0, kind: input, shape index: {}]   ;;  %s1013_s1 = inlined_call_operand.hbm [shape: f32[10,32], index: 1, kind: input, shape index: {}]   ;;  %s1014_s2 = inlined_call_operand.vmem [shape: f32[1,32], index: 2, kind: input, shape index: {}]   ;;  %s1015_s3 = inlined_call_operand.hbm [shape: f32[32,32], index: 3, kind: input, shape index: {}]   ;;  %s1016_s4 = inlined_call_operand.vmem [shape: f32[1,32], index: 4, kind: input, shape index: {}]   ;;  %s1017_s5 = inlined_call_operand.vmem [shape: f32[1,32], index: 5, kind: input, shape index: {}]   ;;  %s1018_s6 = inlined_call_operand.hbm [shape: f32[32,32], index: 6, kind: input, shape index: {}]   ;;  %s1019_s7 = inlined_call_operand.hbm [shape: f32[32,256], index: 7, kind: input, shape index: {}]   ;;  %s1020_s8 = inlined_call_operand.hbm [shape: f32[10,256], index: 8, kind: input, shape index: {}]   ;;  %s1021_s9 = inlined_call_operand.vmem [shape: f32[1,256], index: 9, kind: input, shape index: {}]   ;;  %s1022_s10 = inlined_call_operand.hbm [shape: f32[16,128], index: 10, kind: output, shape index: {}]  }
   0x1   :  { %16 = vsyncpa [#allocation6], 0 }
   0x2   :  { %17 = vsyncpa [#allocation9], 0 }
   0x3   :  { %18 = vsyncpa [#allocation12], 0 }
   0x4   :  { %19 = vsyncpa [#allocation4], 0  ;;  %s865_s13 = smov [#allocation5]   ;;  %s866_s15 = smov [#allocation8]  }
   0x5   :  { %s37_s14 = sshll.u32 %s865_s13, 4  ;;  %s67_s16 = sshll.u32 %s866_s15, 4  ;;  %s38_s14 = int_to_ptr.vmem [resolvable:$true] %s37_s14  ;;  %s68_s16 = int_to_ptr.vmem [resolvable:$true] %s67_s16 }
   0x6   :  { %s723_s17 = scalar_lea.vmem %s38_s14, 256  ;;  %p728_p1 = scmp.lt.s32.totalorder %s38_s14, %s38_s14 }
   0x7   :  { %p724_p0 = scmp.ne.s32.totalorder %s38_s14, %s723_s17  ;;  %p729_p2 = scmp.lt.s32.totalorder %s723_s17, %s723_s17 }
   0x9   :  { %p730_p3 = por %p729_p2, %p728_p1 }
   0xb   :  { %p731_p4 = pnand %p730_p3, %p724_p0 }
   0xd   :  { %734 = shalt.err (!%p731_p4)
}
   0xe   :  { %s867_s18 = smov 128   ;;  %s868_s19 = smov 8  }
   0xf   :  { %43 = dma.hbm_to_vmem [thread:$0]  %s1013_s1, 256, %s38_s14, [#allocation6], %s867_s18, %s867_s18, %s868_s19  }
  0x10   :  { %s743_s22 = scalar_lea.vmem %s68_s16, 512  ;;  %p748_p6 = scmp.lt.s32.totalorder %s68_s16, %s68_s16 }
  0x11   :  { %p744_p5 = scmp.ne.s32.totalorder %s68_s16, %s743_s22  ;;  %p749_p7 = scmp.lt.s32.totalorder %s743_s22, %s743_s22 }
  0x13   :  { %p750_p8 = por %p749_p7, %p748_p6 }
  0x15   :  { %p751_p9 = pnand %p750_p8, %p744_p5 }
  0x17   :  { %754 = shalt.err (!%p751_p9)
}
  0x18   :  { %73 = dma.hbm_to_vmem [thread:$0]  %s1018_s6, 512, %s68_s16, [#allocation9], %s867_s18, %s867_s18, %s868_s19  }
  0x19   :  { %s869_s25 = smov [#allocation2]   ;;  %s870_s27 = smov [#allocation7]  }
  0x1a   :  { %s25_s26 = sshll.u32 %s869_s25, 4  ;;  %s51_s28 = sshll.u32 %s870_s27, 4  ;;  %s26_s26 = int_to_ptr.vmem [resolvable:$true] %s25_s26  ;;  %s52_s28 = int_to_ptr.vmem [resolvable:$true] %s51_s28 }
  0x1b   :  { %s763_s1 = scalar_lea.vmem %s26_s26, 256  ;;  %p768_p11 = scmp.lt.s32.totalorder %s26_s26, %s26_s26 }
  0x1c   :  { %p764_p10 = scmp.ne.s32.totalorder %s26_s26, %s763_s1  ;;  %p769_p12 = scmp.lt.s32.totalorder %s763_s1, %s763_s1 }
  0x1e   :  { %p770_p13 = por %p769_p12, %p768_p11 }
  0x20   :  { %p771_p0 = pnand %p770_p13, %p764_p10 }
  0x22   :  { %774 = shalt.err (!%p771_p0)
}
  0x23   :  { %31 = dma.hbm_to_vmem [thread:$0]  %s1012_s0, 256, %s26_s26, [#allocation3], %s867_s18, %s867_s18, %s868_s19  }
  0x24   :  { %s783_s6 = scalar_lea.vmem %s52_s28, 512  ;;  %p788_p2 = scmp.lt.s32.totalorder %s52_s28, %s52_s28 }
  0x25   :  { %p784_p1 = scmp.ne.s32.totalorder %s52_s28, %s783_s6  ;;  %p789_p3 = scmp.lt.s32.totalorder %s783_s6, %s783_s6 }
  0x27   :  { %p790_p4 = por %p789_p3, %p788_p2 }
  0x29   :  { %p791_p5 = pnand %p790_p4, %p784_p1 }
  0x2b   :  { %794 = shalt.err (!%p791_p5)
}
  0x2c   :  { %57 = dma.hbm_to_vmem [thread:$0]  %s1015_s3, 512, %s52_s28, [#allocation6], %s867_s18, %s867_s18, %s868_s19  }
  0x2d   :  { %s871_s13 = smov [#allocation10]  }
  0x2e   :  { %s79_s14 = sshll.u32 %s871_s13, 4  ;;  %s80_s14 = int_to_ptr.vmem [resolvable:$true] %s79_s14 }
  0x2f   :  { %s803_s15 = scalar_lea.vmem %s80_s14, 1024  ;;  %p808_p7 = scmp.lt.s32.totalorder %s80_s14, %s80_s14 }
  0x30   :  { %p804_p6 = scmp.ne.s32.totalorder %s80_s14, %s803_s15  ;;  %p809_p8 = scmp.lt.s32.totalorder %s803_s15, %s803_s15 }
  0x32   :  { %p810_p9 = por %p809_p8, %p808_p7 }
  0x34   :  { %p811_p10 = pnand %p810_p9, %p804_p6 }
  0x36   :  { %814 = shalt.err (!%p811_p10)
}
  0x37   :  { %s872_s0 = smov 256   ;;  %s873_s16 = smov 16  }
  0x38   :  { %85 = dma.hbm_to_vmem [thread:$0]  %s1019_s7, 1024, %s80_s14, [#allocation9], %s872_s0, %s872_s0, %s873_s16  }
  0x39   :  { %s874_s21 = smov [#allocation11]  }
  0x3a   :  { %s91_s22 = sshll.u32 %s874_s21, 4  ;;  %s92_s22 = int_to_ptr.vmem [resolvable:$true] %s91_s22 }
  0x3b   :  { %s823_s3 = scalar_lea.vmem %s92_s22, 512  ;;  %p828_p12 = scmp.lt.s32.totalorder %s92_s22, %s92_s22 }
  0x3c   :  { %p824_p11 = scmp.ne.s32.totalorder %s92_s22, %s823_s3  ;;  %p829_p13 = scmp.lt.s32.totalorder %s823_s3, %s823_s3 }
  0x3e   :  { %p830_p0 = por %p829_p13, %p828_p12 }
  0x40   :  { %p831_p1 = pnand %p830_p0, %p824_p11 }
  0x42   :  { %834 = shalt.err (!%p831_p1)
}
  0x43   :  { %97 = dma.hbm_to_vmem [thread:$0]  %s1020_s8, 512, %s92_s22, [#allocation12], %s872_s0, %s872_s0, %s873_s16  }
  0x44   :  { %855 = dma.done.wait [#allocation3], 256  }
  0x45   :  { %856 = vsyncadd [#allocation3], 4294967040 }
  0x46   :  { %857 = dma.done.wait [#allocation6], 768  }
  0x47   :  { %858 = vsyncadd [#allocation6], 4294966528 }
  0x48   :  { %859 = dma.done.wait [#allocation9], 1536  }
  0x49   :  { %860 = vsyncadd [#allocation9], 4294965760 }
  0x4a   :  { %861 = dma.done.wait [#allocation12], 512  }
  0x4b   :  { %862 = vsyncadd [#allocation12], 4294966784  ;;  %vm136_vm0 = vcmask 1041408   ;;  %vm129_vm1 = vcmask 80896   ;;  %v121_v0 = vld [vmem:[#allocation5 + $0x8] sm:$0x3]  ;;  %v513_v54 = vlaneseq }
  0x4c   :  { %v120_v1 = vld [vmem:[#allocation5] sm:$0xff]  ;;  %v962_v2 = vld [vmem:[#allocation2] sm:$0xff]  ;;  %666 = vmatprep.subr.msk.mxu0 %vm136_vm0, %v121_v0  ;;  %v968_v3 = vld [vmem:[#allocation2 + $0x8] sm:$0xff]  ;;  %vm228_vm2 = vcmask 261120   ;;  %v875_v42 = vmov 0.0   ;;  %s876_s28 = smov [#allocation13]  }
  0x4d   :  { %670 = vmatprep.mubr.msk.f32.mxu0 %vm129_vm1, %v962_v2  ;;  %667 = vmatpush3.msk.msra.mxu0 %vm136_vm0, %v121_v0  ;;  %v220_v4 = vld [vmem:[#allocation7 + $0x18] sm:$0xff]  ;;  %v219_v5 = vld [vmem:[#allocation7 + $0x10] sm:$0xff]  ;;  %v218_v6 = vld [vmem:[#allocation7 + $0x8] sm:$0xff]  ;;  %v514_v55 = vshrl.u32 %v513_v54, 7  ;;  %s619_s1 = sshll.u32 %s876_s28, 4  ;;  %s620_s1 = int_to_ptr.vmem [resolvable:$true] %s619_s1 }
  0x4e   :  { %668 = vmatprep.subr.mxu0 %v120_v1  ;;  %673 = vmatprep.subr.mxu1 %v220_v4  ;;  %v217_v7 = vld [vmem:[#allocation7] sm:$0xff]  ;;  %v328_v15 = vld [vmem:[#allocation8 + $0x18] sm:$0xff]  ;;  %v327_v16 = vld [vmem:[#allocation8 + $0x10] sm:$0xff]  ;;  %p840_p3 = scmp.lt.s32.totalorder %s620_s1, %s620_s1 }
  0x4f   :  { %669 = vmatpush3.msra.mxu0 %v120_v1  ;;  %674 = vmatpush3.msra.mxu1 %v220_v4  ;;  %v634_v8 = vld [vmem:[%s1014_s2] ss:$0 sm:$0xff]  ;;  %v326_v17 = vld [vmem:[#allocation8 + $0x8] sm:$0xff]  ;;  %v423_v19 = vld [vmem:[#allocation10 + $0x38] sm:$0xff]  ;;  %v515_v57 = vsub.s32 0, %v514_v55  ;;  %v519_v59 = vsub.s32 1, %v514_v55 }
  0x50   :  { %671 = vmatmul.mubr.msk.f32.vlgmr.msra.gmra.mxu0 %vm129_vm1, %v968_v3  ;;  %675 = vmatprep.subr.mxu1 %v219_v5  ;;  %v325_v18 = vld [vmem:[#allocation8] sm:$0xff]  ;;  %v510_v20 = vld [vmem:[#allocation11 + $0x18] sm:$0x3]  ;;  %v422_v21 = vld [vmem:[#allocation10 + $0x30] sm:$0xff] }
  0x51   :  { %676 = vmatpush3.msra.mxu1 %v219_v5  ;;  %684 = vmatprep.subr.mxu0 %v328_v15  ;;  %v421_v22 = vld [vmem:[#allocation10 + $0x28] sm:$0xff]  ;;  %v638_v23 = vld [vmem:[%s1016_s4] ss:$0 sm:$0xff]  ;;  %v509_v37 = vld [vmem:[#allocation11 + $0x10] sm:$0x3] }
  0x52   :  { %677 = vmatprep.subr.mxu1 %v218_v6  ;;  %685 = vmatpush3.msra.mxu0 %v328_v15  ;;  %v641_v33 = vld [vmem:[%s1017_s5] ss:$0 sm:$0xff]  ;;  %v508_v38 = vld [vmem:[#allocation11 + $0x8] sm:$0xff]  ;;  %v419_v41 = vld [vmem:[#allocation10 + $0x18] sm:$0xff] }
  0x53   :  { %678 = vmatpush3.msra.mxu1 %v218_v6  ;;  %686 = vmatprep.subr.mxu0 %v327_v16  ;;  %v420_v39 = vld [vmem:[#allocation10 + $0x20] sm:$0xff]  ;;  %v418_v43 = vld [vmem:[#allocation10 + $0x10] sm:$0xff]  ;;  %v417_v44 = vld [vmem:[#allocation10 + $0x8] sm:$0xff] }
  0x54   :  { %679 = vmatprep.subr.mxu1 %v217_v7  ;;  %687 = vmatpush3.msra.mxu0 %v327_v16  ;;  %v507_v40 = vld [vmem:[#allocation11] sm:$0xff] }
  0x55   :  { %680 = vmatpush3.msra.mxu1 %v217_v7  ;;  %688 = vmatprep.subr.mxu0 %v326_v17  ;;  %v416_v45 = vld [vmem:[#allocation10] sm:$0xff] }
  0x56   :  { %689 = vmatpush3.msra.mxu0 %v326_v17  ;;  %454 = vmatprep.subr.mxu1 %v423_v19  ;;  %v511_v58 = vld [vmem:[%s1021_s9] sm:$0x3]  ;;  %s835_s9 = scalar_lea.vmem %s620_s1, 256 }
  0x57   :  { %690 = vmatprep.subr.mxu0 %v325_v18  ;;  %v516_v61 = vrot.slane %v511_v58, %v515_v57  ;;  %v520_v62 = vrot.slane %v511_v58, %v519_v59  ;;  %p836_p2 = scmp.ne.s32.totalorder %s620_s1, %s835_s9  ;;  %p841_p4 = scmp.lt.s32.totalorder %s835_s9, %s835_s9 }
  0x58   :  { %691 = vmatpush3.msra.mxu0 %v325_v18 }
  0x59   :  { %646 = vmatprep.subr.msk.mxu0 %vm136_vm0, %v510_v20  ;;  %p842_p5 = por %p841_p4, %p840_p3 }
  0x5b   :  { %p843_p6 = pnand %p842_p5, %p836_p2 }
 0x110   :  { %v672_v9 = vpop.f32.mrf.mxu0 }
 0x111   :  { %v212_v10 = vadd.f32 %v672_v9, %v634_v8 }
 0x112   :  { %v206_v11 = vpop.f32.mrf.mxu0 }
 0x113   :  { %v207_v12 = vadd.f32 %v634_v8, %v206_v11 }
 0x115   :  { %707 = vtanh.f32 %v207_v12 }
 0x116   :  { %709 = vtanh.f32 %v212_v10 }
 0x122   :  { %v975_v13 = vpop.eup %707 }
 0x123   :  { %v977_v14 = vpop.eup %709  ;;  %681 = vmatprep.mubr.msk.f32.mxu1 %vm228_vm2, %v975_v13  ;;  %v410_v46 = vmul.f32 %v975_v13, %v975_v13 }
 0x124   :  { %682 = vmatmul.mubr.msk.f32.vlgmr.msra.gmra.mxu1 %vm228_vm2, %v977_v14  ;;  %v411_v48 = vmul.f32 %v977_v14, %v977_v14 }
 0x125   :  { %455 = vmatpush1.msra.mxu1 %v422_v21  ;;  %494 = vmatprep.mubr.f32.mxu1 %v875_v42  ;;  %v412_v49 = vsub.f32 1.0, %v410_v46 }
 0x126   :  { %456 = vmatprep.subr.mxu1 %v421_v22  ;;  %v413_v52 = vsub.f32 1.0, %v411_v48 }
 0x127   :  { %457 = vmatpush1.msra.mxu1 %v420_v39 }
 0x128   :  { %458 = vmatprep.subr.mxu1 %v419_v41 }
 0x129   :  { %459 = vmatpush1.msra.mxu1 %v418_v43 }
 0x12a   :  { %460 = vmatprep.subr.mxu1 %v417_v44 }
 0x12b   :  { %461 = vmatpush1.msra.mxu1 %v416_v45 }
 0x1e4   :  { %v683_v24 = vpop.f32.mrf.mxu1 }
 0x1e5   :  { %v307_v25 = vadd.f32 %v683_v24, %v638_v23 }
 0x1e6   :  { %v301_v26 = vpop.f32.mrf.mxu1 }
 0x1e7   :  { %711 = vtanh.f32 %v307_v25  ;;  %v302_v27 = vadd.f32 %v638_v23, %v301_v26 }
 0x1e9   :  { %713 = vtanh.f32 %v302_v27 }
 0x1f4   :  { %v712_v28 = vpop.eup %711 }
 0x1f5   :  { %v314_v29 = vmul.f32 %v712_v28, %v712_v28 }
 0x1f6   :  { %v714_v30 = vpop.eup %713 }
 0x1f7   :  { %v313_v31 = vmul.f32 %v714_v30, %v714_v30  ;;  %v316_v32 = vsub.f32 1.0, %v314_v29 }
 0x1f9   :  { %v315_v34 = vsub.f32 1.0, %v313_v31  ;;  %v324_v36 = vmul.f32 %v641_v33, %v316_v32 }
 0x1fb   :  { %v323_v35 = vmul.f32 %v641_v33, %v315_v34 }
 0x1fd   :  { %692 = vmatprep.mubr.msk.f32.mxu0 %vm228_vm2, %v323_v35 }
 0x1fe   :  { %693 = vmatmul.mubr.msk.f32.vlgmr.msra.gmra.mxu0 %vm228_vm2, %v324_v36 }
 0x1ff   :  { %647 = vmatpush1.msk.msra.mxu0 %vm136_vm0, %v509_v37  ;;  %593 = vmatprep.mubr.f32.mxu0 %v875_v42 }
 0x200   :  { %559 = vmatprep.subr.mxu0 %v508_v38 }
 0x201   :  { %560 = vmatpush1.msra.mxu0 %v507_v40 }
 0x202   :  { %648 = vmatmul.mubr.msk.f32.vlgmr.msra.gmra.mxu0 %vm129_vm1, %v962_v2 }
 0x203   :  { %599 = vmatprep.mubr.f32.mxu0 %v875_v42 }
 0x206   :  { %649 = vmatmul.mubr.msk.f32.gmra.mxu0 %vm129_vm1, %v968_v3 }
 0x2be   :  { %v694_v47 = vpop.f32.mrf.mxu0 }
 0x2bf   :  { %v415_v53 = vmul.f32 %v694_v47, %v413_v52 }
 0x2c0   :  { %v401_v50 = vpop.f32.mrf.mxu0 }
 0x2c1   :  { %v414_v51 = vmul.f32 %v412_v49, %v401_v50 }
 0x2c2   :  { %v595_v56 = vpop.f32.mrf.mxu0 }
 0x2c3   :  { %644 = vmatmul.mubr.msk.f32.vlgmr.msra.gmra.mxu1 %vm228_vm2, %v414_v51  ;;  %v596_v0 = vadd.f32 %v595_v56, %v516_v61 }
 0x2c4   :  { %500 = vmatprep.mubr.f32.mxu1 %v875_v42  ;;  %v597_v60 = vpop.f32.mrf.mxu0 }
 0x2c5   :  { %v598_v2 = vadd.f32 %v597_v60, %v520_v62 }
 0x2c6   :  { %v601_v63 = vpop.f32.mrf.mxu0 }
 0x2c7   :  { %645 = vmatmul.mubr.msk.f32.gmra.mxu1 %vm228_vm2, %v415_v53  ;;  %v602_v6 = vadd.f32 %v601_v63, %v516_v61 }
 0x2c8   :  { %v603_v4 = vpop.f32.mrf.mxu0 }
 0x2c9   :  { %v604_v10 = vadd.f32 %v603_v4, %v520_v62 }
 0x383   :  { %v496_v1 = vpop.f32.mrf.mxu1 }
 0x384   :  { %v606_v5 = vmul.f32 %v596_v0, %v496_v1 }
 0x385   :  { %v498_v3 = vpop.f32.mrf.mxu1 }
 0x386   :  { %v607_v7 = vmul.f32 %v598_v2, %v498_v3 }
 0x387   :  { %v502_v8 = vpop.f32.mrf.mxu1 }
 0x388   :  { %v610_v9 = vadd.f32 %v607_v7, %v606_v5  ;;  %v608_v12 = vmul.f32 %v602_v6, %v502_v8 }
 0x389   :  { %v504_v11 = vpop.f32.mrf.mxu1 }
 0x38a   :  { %612 = vst [vmem:[#allocation13] sm:$0xff] %v610_v9  ;;  %v609_v13 = vmul.f32 %v604_v10, %v504_v11 }
 0x38c   :  { %v611_v14 = vadd.f32 %v609_v13, %v608_v12 }
 0x38e   :  { %613 = vst [vmem:[#allocation13 + $0x8] sm:$0xff] %v611_v14 }
 0x38f   :  { %846 = shalt.err (!%p843_p6)
}
 0x390   :  { %625 = dma.vmem_to_hbm [thread:$0]  %s620_s1, 256, %s1022_s10, [#allocation4], %s867_s18, %s867_s18, %s868_s19  }
 0x391   :  { %863 = dma.done.wait [#allocation4], 256  }
 0x392   :  { %864 = vsyncadd [#allocation4], 4294967040 }
 0x393   :  { %629 = vsyncpa [#allocation3], 1 }
 0x394   :  { %630 = vsyncpa [#allocation6], 1 }
 0x395   :  { %631 = vsyncpa [#allocation9], 1 }
 0x396   :  { %632 = vsyncpa [#allocation12], 1 }
 0x397   :  { %633 = vsyncpa [#allocation4], 1 }

</bundles_post_ra>
